<compile_context>
chip_gen: v7x
topology: tpu7x:2x2x1
jax: 0.10.0
libtpu: 0.0.40
codegen_flags: <defaults>
</compile_context>

<pallas_src>
import functools

import jax
import jax.numpy as jnp
from jax import lax
from jax.experimental import pallas as pl
from jax.experimental.pallas import tpu as pltpu


# ---------------------------------------------------------------------------
# Hardware-aware budgets
# ---------------------------------------------------------------------------
def _vmem_budgets():
    """(resident_budget_bytes, vmem_limit_bytes) derived from this chip's VMEM."""
    try:
        cap = int(pltpu.get_tpu_info().vmem_capacity_bytes)
    except Exception:
        cap = 64 * 1024 * 1024          # conservative (v7x-sized) fallback
    vmem_limit = int(cap * 0.85)
    resident_budget = int(cap * 0.60)   # adj + a few f32 (n_pad, c_pad) working arrays
    return resident_budget, vmem_limit


def _round_up(x, m):
    return (x + m - 1) // m * m


def _prop_tile(n_pad128):
    # Propagation tile for the tiled fallback.  n_pad is padded UP to a multiple
    # of this tile (fixes the old divisibility trap that silently fell back to
    # 128x128 tiles for awkward N).
    if n_pad128 >= 2048:
        return 1024
    if n_pad128 >= 512:
        return 512
    return n_pad128


def _k_tile(dim, cap=2048):
    # Feature-dim tile for the MLP's K axis (dim is a multiple of 128).
    if dim <= cap:
        return dim
    for t in (2048, 1024, 512, 256, 128):
        if dim % t == 0:
            return t
    return 128


# ---------------------------------------------------------------------------
# Kernel 1: fused MLP  (linear_in + relu + linear_out)
#   grid = (row tiles "parallel", feature-K tiles "arbitrary")
#   hidden activation accumulated in VMEM scratch -> no HBM round trip for h.
# ---------------------------------------------------------------------------
def _mlp_kernel(x_ref, w_in_ref, b_in_ref, w_out_ref, b_out_ref, o_ref, h_acc):
    k = pl.program_id(1)

    @pl.when(k == 0)
    def _():
        h_acc[...] = jnp.zeros_like(h_acc)

    h_acc[...] += jnp.dot(x_ref[...], w_in_ref[...],
                          preferred_element_type=jnp.float32)

    @pl.when(k == pl.num_programs(1) - 1)
    def _():
        h = jnp.maximum(h_acc[...] + b_in_ref[...], 0.0)
        z = jnp.dot(h, w_out_ref[...], preferred_element_type=jnp.float32)
        o_ref[...] = (z + b_out_ref[...]).astype(o_ref.dtype)


def pallas_fused_mlp(x, w_in, b_in, w_out, b_out, vmem_limit):
    n_pad, f_pad = x.shape
    h_pad = w_in.shape[1]
    c_pad = w_out.shape[1]
    tm = min(512, n_pad)
    tk = _k_tile(f_pad)
    grid = (n_pad // tm, f_pad // tk)

    cost = pl.CostEstimate(
        flops=2 * n_pad * f_pad * h_pad + 2 * n_pad * h_pad * c_pad,
        transcendentals=0,
        bytes_accessed=4 * (n_pad * f_pad + f_pad * h_pad + h_pad
                            + h_pad * c_pad + c_pad + n_pad * c_pad),
    )
    return pl.pallas_call(
        _mlp_kernel,
        out_shape=jax.ShapeDtypeStruct((n_pad, c_pad), jnp.float32),
        grid=grid,
        in_specs=[
            pl.BlockSpec((tm, tk), lambda i, k: (i, k)),        # x tile
            pl.BlockSpec((tk, h_pad), lambda i, k: (k, 0)),     # W_in K-slab
            pl.BlockSpec((1, h_pad), lambda i, k: (0, 0)),      # b_in resident
            pl.BlockSpec((h_pad, c_pad), lambda i, k: (0, 0)),  # W_out resident
            pl.BlockSpec((1, c_pad), lambda i, k: (0, 0)),      # b_out resident
        ],
        out_specs=pl.BlockSpec((tm, c_pad), lambda i, k: (i, 0)),
        scratch_shapes=[pltpu.VMEM((tm, h_pad), jnp.float32)],
        compiler_params=pltpu.CompilerParams(
            dimension_semantics=("parallel", "arbitrary"),
            vmem_limit_bytes=vmem_limit),
        cost_estimate=cost,
    )(x, w_in, b_in, w_out, b_out)


# ---------------------------------------------------------------------------
# Kernel 2a: fused propagation, bf16 adj + z/x0 resident in VMEM for all layers
# ---------------------------------------------------------------------------
def _appnp_resident_kernel(adj_ref, z0_ref, o_ref, *, n_layers, alpha):
    adj = adj_ref[...]                       # bf16, DMA'd from HBM exactly once
    x0 = z0_ref[...]                         # f32
    bias = (1.0 - alpha) * x0                # computed once, not per layer

    def body(_, z):
        az = jnp.dot(adj, z.astype(jnp.bfloat16),
                     preferred_element_type=jnp.float32)
        return alpha * az + bias

    z = lax.fori_loop(0, n_layers, body, x0)
    o_ref[...] = z.astype(o_ref.dtype)


def pallas_appnp_resident(adj_bf16, z0, n_layers, alpha, vmem_limit):
    n_pad, c_pad = z0.shape
    cost = pl.CostEstimate(
        flops=2 * n_layers * n_pad * n_pad * c_pad,
        transcendentals=0,
        bytes_accessed=2 * n_pad * n_pad + 4 * 2 * n_pad * c_pad,
    )
    return pl.pallas_call(
        functools.partial(_appnp_resident_kernel, n_layers=n_layers, alpha=alpha),
        out_shape=jax.ShapeDtypeStruct((n_pad, c_pad), jnp.float32),
        in_specs=[
            pl.BlockSpec((n_pad, n_pad), lambda: (0, 0)),
            pl.BlockSpec((n_pad, c_pad), lambda: (0, 0)),
        ],
        out_specs=pl.BlockSpec((n_pad, c_pad), lambda: (0, 0)),
        compiler_params=pltpu.CompilerParams(vmem_limit_bytes=vmem_limit),
        cost_estimate=cost,
    )(adj_bf16, z0)


# ---------------------------------------------------------------------------
# Kernel 2b: tiled per-layer propagation (adj too large for VMEM)
#   adj tile streamed (bf16), z fully resident (constant index_map), x0 row tile.
# ---------------------------------------------------------------------------
def _prop_step_kernel(adj_ref, z_ref, x0_ref, o_ref, acc_ref, *, alpha):
    k = pl.program_id(1)
    tk = adj_ref.shape[1]

    @pl.when(k == 0)
    def _():
        acc_ref[...] = ((1.0 - alpha) / alpha) * x0_ref[...]

    start = pl.multiple_of(k * tk, tk)
    z_blk = z_ref[pl.ds(start, tk), :].astype(jnp.bfloat16)
    acc_ref[...] += jnp.dot(adj_ref[...], z_blk,
                            preferred_element_type=jnp.float32)

    @pl.when(k == pl.num_programs(1) - 1)
    def _():
        o_ref[...] = (alpha * acc_ref[...]).astype(o_ref.dtype)


def pallas_appnp_step_tiled(adj_bf16, z, x0, alpha, tm, tk, vmem_limit):
    n_pad, c_pad = z.shape
    grid = (n_pad // tm, n_pad // tk)
    cost = pl.CostEstimate(
        flops=2 * n_pad * n_pad * c_pad,
        transcendentals=0,
        bytes_accessed=2 * n_pad * n_pad + 4 * 3 * n_pad * c_pad,
    )
    return pl.pallas_call(
        functools.partial(_prop_step_kernel, alpha=alpha),
        out_shape=jax.ShapeDtypeStruct((n_pad, c_pad), jnp.float32),
        grid=grid,
        in_specs=[
            pl.BlockSpec((tm, tk), lambda i, k: (i, k)),           # adj tile (bf16)
            pl.BlockSpec((n_pad, c_pad), lambda i, k: (0, 0)),     # z resident
            pl.BlockSpec((tm, c_pad), lambda i, k: (i, 0)),        # x0 row tile
        ],
        out_specs=pl.BlockSpec((tm, c_pad), lambda i, k: (i, 0)),
        scratch_shapes=[pltpu.VMEM((tm, c_pad), jnp.float32)],
        compiler_params=pltpu.CompilerParams(
            dimension_semantics=("parallel", "arbitrary"),
            vmem_limit_bytes=vmem_limit),
        cost_estimate=cost,
    )(adj_bf16, z, x0)


# ---------------------------------------------------------------------------
# Model forward
# ---------------------------------------------------------------------------
def prepare_adj(adj, n_pad):
    """Pad + cast the (static) graph adjacency once.  For a fixed graph this
    result should be cached across forward calls (set_adj happens once)."""
    n = adj.shape[0]
    return jnp.zeros((n_pad, n_pad), jnp.bfloat16).at[:n, :n].set(
        adj.astype(jnp.bfloat16))


def appnp_forward(params, x, adj, n_layers, alpha=0.9, force_tiled_prop=False):
    n, f = x.shape
    h_dim = params["w_in"].shape[1]
    c = params["w_out"].shape[1]

    resident_budget, vmem_limit = _vmem_budgets()

    n_pad128 = _round_up(n, 128)
    tile = _prop_tile(n_pad128)
    n_pad = _round_up(n_pad128, tile)        # node dim padded to the prop tile
    f_pad = _round_up(f, 128)
    h_pad = _round_up(h_dim, 128)
    c_pad = _round_up(c, 128)

    # Zero-pad to 128-aligned, lane-dense shapes (unpadded at the end).
    x_p = jnp.zeros((n_pad, f_pad), jnp.float32).at[:n, :f].set(x)
    w_in_p = jnp.zeros((f_pad, h_pad), jnp.float32).at[:f, :h_dim].set(params["w_in"])
    b_in_p = jnp.zeros((1, h_pad), jnp.float32).at[:, :h_dim].set(params["b_in"])
    w_out_p = jnp.zeros((h_pad, c_pad), jnp.float32).at[:h_dim, :c].set(params["w_out"])
    b_out_p = jnp.zeros((1, c_pad), jnp.float32).at[:, :c].set(params["b_out"])
    adj_p = prepare_adj(adj, n_pad)          # bf16, no host-side alpha scaling

    # Fused linear_in + relu + linear_out (dropout = identity in eval mode).
    z0 = pallas_fused_mlp(x_p, w_in_p, b_in_p, w_out_p, b_out_p, vmem_limit)

    adj_bytes = n_pad * n_pad * 2            # bf16
    working_bytes = 8 * n_pad * c_pad * 4    # z / x0 / bias / carry copies (f32)
    if (not force_tiled_prop) and (adj_bytes + working_bytes <= resident_budget):
        z = pallas_appnp_resident(adj_p, z0, n_layers, alpha, vmem_limit)
    else:
        z = z0
        for _ in range(n_layers):
            z = pallas_appnp_step_tiled(adj_p, z, z0, alpha,
                                        tm=tile, tk=tile, vmem_limit=vmem_limit)

    return z[:n, :c]


# ---------------------------------------------------------------------------
# Init / data helpers
# ---------------------------------------------------------------------------
def init_params(key, n_feat, n_hid, n_classes):
    # Mimics torch.nn.Linear defaults (uniform +/- 1/sqrt(fan_in)); weights stored
    # already transposed: w_in [n_feat, n_hid], w_out [n_hid, n_classes].
    k1, k2, k3, k4 = jax.random.split(key, 4)
    lim_in = 1.0 / jnp.sqrt(n_feat)
    lim_out = 1.0 / jnp.sqrt(n_hid)
    w_in = jax.random.uniform(k1, (n_feat, n_hid), jnp.float32, -lim_in, lim_in)
    b_in = jax.random.uniform(k2, (1, n_hid), jnp.float32, -lim_in, lim_in)
    w_out = jax.random.uniform(k3, (n_hid, n_classes), jnp.float32, -lim_out, lim_out)
    b_out = jax.random.uniform(k4, (1, n_classes), jnp.float32, -lim_out, lim_out)
    return {"w_in": w_in, "b_in": b_in, "w_out": w_out, "b_out": b_out}


def make_adj(key, n_nodes):
    # Random symmetric graph with self loops, row-normalized (dense).
    a = (jax.random.uniform(key, (n_nodes, n_nodes)) < 0.1).astype(jnp.float32)
    a = jnp.maximum(a, a.T)
    a = a + jnp.eye(n_nodes, dtype=jnp.float32)
    deg = jnp.sum(a, axis=1, keepdims=True)
    return a / deg


if __name__ == "__main__":
    # Small deterministic example consistent with the module's forward:
    # args.n_feat=32, args.n_hid=32, args.n_classes=8, args.n_layers=3
    N_NODES, N_FEAT, N_HID, N_CLASSES, N_LAYERS = 64, 32, 32, 8, 3
    ALPHA = 0.9

    key = jax.random.PRNGKey(0)
    k_x, k_adj, k_p = jax.random.split(key, 3)

    x = jax.random.normal(k_x, (N_NODES, N_FEAT), jnp.float32)
    adj = make_adj(k_adj, N_NODES)
    params = init_params(k_p, N_FEAT, N_HID, N_CLASSES)

    # Primary path: fused MLP + resident fused propagation (adj in VMEM for all layers).
    out = appnp_forward(params, x, adj, N_LAYERS, alpha=ALPHA)
    out = jax.block_until_ready(out)

    # Also exercise the tiled, pipelined per-layer fallback path.
    out_tiled = appnp_forward(params, x, adj, N_LAYERS, alpha=ALPHA, force_tiled_prop=True)
    out_tiled = jax.block_until_ready(out_tiled)

    # Pure-JAX f32 reference (bf16 adjacency loosens the tolerance slightly).
    h_ref = jnp.maximum(x @ params["w_in"] + params["b_in"], 0.0)
    z_ref = h_ref @ params["w_out"] + params["b_out"]
    x0_ref = z_ref
    for _ in range(N_LAYERS):
        z_ref = ALPHA * (adj @ z_ref) + (1.0 - ALPHA) * x0_ref

    assert out.shape == (N_NODES, N_CLASSES)
    assert out_tiled.shape == (N_NODES, N_CLASSES)
    assert jnp.allclose(out, z_ref, atol=3e-2, rtol=3e-2)
    assert jnp.allclose(out_tiled, z_ref, atol=3e-2, rtol=3e-2)

    print("KERNEL_OK")
</pallas_src>

<mosaic_0001>
module attributes {stable_mosaic.version = 11 : i64} {
  func.func @_mlp_kernel(%arg0: i32, %arg1: i32, %arg2: memref<128x128xf32, #tpu.memory_space<vmem>>, %arg3: memref<128x128xf32, #tpu.memory_space<vmem>>, %arg4: memref<1x128xf32, #tpu.memory_space<vmem>>, %arg5: memref<128x128xf32, #tpu.memory_space<vmem>>, %arg6: memref<1x128xf32, #tpu.memory_space<vmem>>, %arg7: memref<128x128xf32, #tpu.memory_space<vmem>>, %arg8: memref<128x128xf32, #tpu.memory_space<vmem>>) attributes {dimension_semantics = [#tpu.dimension_semantics<parallel>, #tpu.dimension_semantics<arbitrary>], iteration_bounds = array<i64: 1, 1>, scalar_prefetch = 0 : i64, scratch_operands = 1 : i64, tpu.core_type = #tpu.core_type<tc>, window_params = [{transform_indices = @transform_0, window_bounds = array<i64: 128, 128>}, {transform_indices = @transform_1, window_bounds = array<i64: 128, 128>}, {pipeline_mode = #tpu.pipeline_mode<synchronous>, transform_indices = @transform_2, window_bounds = array<i64: 1, 128>}, {pipeline_mode = #tpu.pipeline_mode<synchronous>, transform_indices = @transform_3, window_bounds = array<i64: 128, 128>}, {pipeline_mode = #tpu.pipeline_mode<synchronous>, transform_indices = @transform_4, window_bounds = array<i64: 1, 128>}, {transform_indices = @transform_5, window_bounds = array<i64: 128, 128>}]} {
    %c0_i32 = arith.constant 0 : i32
    %0 = arith.cmpi eq, %arg1, %c0_i32 : i32
    %1 = arith.extui %0 : i1 to i32
    %c0_i32_0 = arith.constant 0 : i32
    %2 = arith.cmpi ne, %1, %c0_i32_0 : i32
    scf.if %2 {
      %cst_10 = arith.constant 0.000000e+00 : f32
      %12 = vector.broadcast %cst_10 : f32 to vector<128x128xf32>
      %c0_11 = arith.constant 0 : index
      %c0_12 = arith.constant 0 : index
      %13 = vector.load %arg8[%c0_11, %c0_12] : memref<128x128xf32, #tpu.memory_space<vmem>>, vector<128x128xf32>
      tpu.vector_store %arg8[%c0_11, %c0_12], %12 {strides = array<i32>} : memref<128x128xf32, #tpu.memory_space<vmem>>, vector<128x128xf32>,
    } else {
    }
    %c0 = arith.constant 0 : index
    %c0_1 = arith.constant 0 : index
    %3 = vector.load %arg8[%c0, %c0_1] : memref<128x128xf32, #tpu.memory_space<vmem>>, vector<128x128xf32>
    %c0_2 = arith.constant 0 : index
    %c0_3 = arith.constant 0 : index
    %4 = vector.load %arg2[%c0_2, %c0_3] : memref<128x128xf32, #tpu.memory_space<vmem>>, vector<128x128xf32>
    %c0_4 = arith.constant 0 : index
    %c0_5 = arith.constant 0 : index
    %5 = vector.load %arg3[%c0_4, %c0_5] : memref<128x128xf32, #tpu.memory_space<vmem>>, vector<128x128xf32>
    %cst = arith.constant dense<0.000000e+00> : vector<128x128xf32>
    %6 = tpu.matmul %4, %5, %cst {dimension_numbers = #tpu.dot_dimension_numbers<[1], [0], [0], [1], [0, 0, 1, 1], [], []>} : vector<128x128xf32>, vector<128x128xf32>, vector<128x128xf32> -> vector<128x128xf32>
    %7 = arith.addf %3, %6 : vector<128x128xf32>
    %c0_6 = arith.constant 0 : index
    %c0_7 = arith.constant 0 : index
    %8 = vector.load %arg8[%c0_6, %c0_7] : memref<128x128xf32, #tpu.memory_space<vmem>>, vector<128x128xf32>
    tpu.vector_store %arg8[%c0_6, %c0_7], %7 {strides = array<i32>} : memref<128x128xf32, #tpu.memory_space<vmem>>, vector<128x128xf32>,
    %c0_i32_8 = arith.constant 0 : i32
    %9 = arith.cmpi eq, %arg1, %c0_i32_8 : i32
    %10 = arith.extui %9 : i1 to i32
    %c0_i32_9 = arith.constant 0 : i32
    %11 = arith.cmpi ne, %10, %c0_i32_9 : i32
    scf.if %11 {
      %c0_10 = arith.constant 0 : index
      %c0_11 = arith.constant 0 : index
      %12 = vector.load %arg8[%c0_10, %c0_11] : memref<128x128xf32, #tpu.memory_space<vmem>>, vector<128x128xf32>
      %c0_12 = arith.constant 0 : index
      %c0_13 = arith.constant 0 : index
      %13 = vector.load %arg4[%c0_12, %c0_13] : memref<1x128xf32, #tpu.memory_space<vmem>>, vector<1x128xf32>
      %14 = vector.broadcast %13 : vector<1x128xf32> to vector<128x128xf32>
      %15 = arith.addf %12, %14 : vector<128x128xf32>
      %cst_14 = arith.constant 0.000000e+00 : f32
      %16 = vector.broadcast %cst_14 : f32 to vector<128x128xf32>
      %17 = arith.maximumf %15, %16 : vector<128x128xf32>
      %c0_15 = arith.constant 0 : index
      %c0_16 = arith.constant 0 : index
      %18 = vector.load %arg5[%c0_15, %c0_16] : memref<128x128xf32, #tpu.memory_space<vmem>>, vector<128x128xf32>
      %cst_17 = arith.constant dense<0.000000e+00> : vector<128x128xf32>
      %19 = tpu.matmul %17, %18, %cst_17 {dimension_numbers = #tpu.dot_dimension_numbers<[1], [0], [0], [1], [0, 0, 1, 1], [], []>} : vector<128x128xf32>, vector<128x128xf32>, vector<128x128xf32> -> vector<128x128xf32>
      %c0_18 = arith.constant 0 : index
      %c0_19 = arith.constant 0 : index
      %20 = vector.load %arg6[%c0_18, %c0_19] : memref<1x128xf32, #tpu.memory_space<vmem>>, vector<1x128xf32>
      %21 = vector.broadcast %20 : vector<1x128xf32> to vector<128x128xf32>
      %22 = arith.addf %19, %21 : vector<128x128xf32>
      %c0_20 = arith.constant 0 : index
      %c0_21 = arith.constant 0 : index
      %23 = vector.load %arg7[%c0_20, %c0_21] : memref<128x128xf32, #tpu.memory_space<vmem>>, vector<128x128xf32>
      tpu.vector_store %arg7[%c0_20, %c0_21], %22 {strides = array<i32>} : memref<128x128xf32, #tpu.memory_space<vmem>>, vector<128x128xf32>,
    } else {
    }
    return
  }
  func.func @transform_0(%arg0: i32, %arg1: i32) -> (i32, i32) {
    %c0_i32 = arith.constant 0 : i32
    return %arg0, %arg1 : i32, i32
  }
  func.func @transform_1(%arg0: i32, %arg1: i32) -> (i32, i32) {
    %c0_i32 = arith.constant 0 : i32
    %c0_i32_0 = arith.constant 0 : i32
    return %arg1, %c0_i32 : i32, i32
  }
  func.func @transform_2(%arg0: i32, %arg1: i32) -> (i32, i32) {
    %c0_i32 = arith.constant 0 : i32
    %c0_i32_0 = arith.constant 0 : i32
    %c0_i32_1 = arith.constant 0 : i32
    return %c0_i32, %c0_i32_0 : i32, i32
  }
  func.func @transform_3(%arg0: i32, %arg1: i32) -> (i32, i32) {
    %c0_i32 = arith.constant 0 : i32
    %c0_i32_0 = arith.constant 0 : i32
    %c0_i32_1 = arith.constant 0 : i32
    return %c0_i32, %c0_i32_0 : i32, i32
  }
  func.func @transform_4(%arg0: i32, %arg1: i32) -> (i32, i32) {
    %c0_i32 = arith.constant 0 : i32
    %c0_i32_0 = arith.constant 0 : i32
    %c0_i32_1 = arith.constant 0 : i32
    return %c0_i32, %c0_i32_0 : i32, i32
  }
  func.func @transform_5(%arg0: i32, %arg1: i32) -> (i32, i32) {
    %c0_i32 = arith.constant 0 : i32
    %c0_i32_0 = arith.constant 0 : i32
    return %arg0, %c0_i32 : i32, i32
  }
}

</mosaic_0001>

<bundles_post_ra>
// kernel: tpu_custom_call.1
= control target key start
LH: loop header
LB: loop body
LE: loop exit
PB: predicated region body
PF: predicated region fallthrough
CT: control target
= control target key end

     0   :  { %10 = vsyncpa [#allocation4], 0  ;;  %s1018_s0 = inlined_call_operand.hbm [shape: f32[128,128], index: 0, kind: input, shape index: {}]   ;;  %s1019_s1 = inlined_call_operand.hbm [shape: f32[128,128], index: 1, kind: input, shape index: {}]   ;;  %s1020_s2 = inlined_call_operand.vmem [shape: f32[1,128], index: 2, kind: input, shape index: {}]   ;;  %s1021_s3 = inlined_call_operand.hbm [shape: f32[128,128], index: 3, kind: input, shape index: {}]   ;;  %s1022_s4 = inlined_call_operand.vmem [shape: f32[1,128], index: 4, kind: input, shape index: {}]   ;;  %s1023_s5 = inlined_call_operand.hbm [shape: f32[128,128], index: 5, kind: output, shape index: {}]  }
   0x1   :  { %11 = vsyncpa [#allocation7], 0 }
   0x2   :  { %12 = vsyncpa [#allocation5], 0  ;;  %s909_s18 = smov [#allocation6]   ;;  %s910_s20 = smov [#allocation3]  }
   0x3   :  { %s30_s19 = sshll.u32 %s909_s18, 4  ;;  %s18_s21 = sshll.u32 %s910_s20, 4  ;;  %s31_s19 = int_to_ptr.vmem [resolvable:$true] %s30_s19  ;;  %s945_s21 = int_to_ptr.vmem [resolvable:$true] %s18_s21 }
   0x4   :  { %s815_s24 = scalar_lea.hbm %s1019_s1, 2048 }
   0x5   :  { %p816_p0 = scmp.ne.s32.totalorder %s1019_s1, %s815_s24  ;;  %p819_p1 = scmp.lt.u32.totalorder %s815_s24, %s1019_s1 }
   0x7   :  { %p821_p2 = pnand %p819_p1, %p816_p0 }
   0x9   :  { %824 = shalt.err (!%p821_p2)
}
   0xa   :  { %s825_s29 = scalar_lea.vmem %s31_s19, 2048  ;;  %p830_p4 = scmp.lt.s32.totalorder %s31_s19, %s31_s19 }
   0xb   :  { %p826_p3 = scmp.ne.s32.totalorder %s31_s19, %s825_s29  ;;  %p831_p5 = scmp.lt.s32.totalorder %s825_s29, %s825_s29 }
   0xd   :  { %p832_p6 = por %p831_p5, %p830_p4 }
   0xf   :  { %p833_p7 = pnand %p832_p6, %p826_p3 }
  0x11   :  { %836 = shalt.err (!%p833_p7)
}
  0x12   :  { %s911_s30 = smov 128   ;;  %s912_s6 = smov 8  }
  0x13   :  { %36 = dma.hbm_to_vmem [thread:$0]  %s1019_s1, 2048, %s31_s19, [#allocation7], %s911_s30, %s911_s30, %s912_s6  }
  0x14   :  { %s837_s11 = scalar_lea.hbm %s1018_s0, 2048 }
  0x15   :  { %p838_p8 = scmp.ne.s32.totalorder %s1018_s0, %s837_s11  ;;  %p841_p9 = scmp.lt.u32.totalorder %s837_s11, %s1018_s0 }
  0x17   :  { %p843_p10 = pnand %p841_p9, %p838_p8 }
  0x19   :  { %846 = shalt.err (!%p843_p10)
}
  0x1a   :  { %s847_s16 = scalar_lea.vmem %s945_s21, 2048  ;;  %p852_p12 = scmp.lt.s32.totalorder %s945_s21, %s945_s21 }
  0x1b   :  { %p848_p11 = scmp.ne.s32.totalorder %s945_s21, %s847_s16  ;;  %p853_p13 = scmp.lt.s32.totalorder %s847_s16, %s847_s16 }
  0x1d   :  { %p854_p0 = por %p853_p13, %p852_p12 }
  0x1f   :  { %p855_p1 = pnand %p854_p0, %p848_p11 }
  0x21   :  { %858 = shalt.err (!%p855_p1)
}
  0x22   :  { %24 = dma.hbm_to_vmem [thread:$0]  %s1018_s0, 2048, %s945_s21, [#allocation4], %s911_s30, %s911_s30, %s912_s6  }
  0x23   :  { %s913_s18 = smov [#allocation8]   ;;  %s859_s23 = scalar_lea.hbm %s1021_s3, 2048 }
  0x24   :  { %s44_s19 = sshll.u32 %s913_s18, 4  ;;  %p860_p2 = scmp.ne.s32.totalorder %s1021_s3, %s859_s23  ;;  %s45_s19 = int_to_ptr.vmem [resolvable:$true] %s44_s19 }
  0x25   :  { %p863_p3 = scmp.lt.u32.totalorder %s859_s23, %s1021_s3 }
  0x27   :  { %p865_p4 = pnand %p863_p3, %p860_p2 }
  0x29   :  { %868 = shalt.err (!%p865_p4)
}
  0x2a   :  { %s869_s28 = scalar_lea.vmem %s45_s19, 2048  ;;  %p874_p6 = scmp.lt.s32.totalorder %s45_s19, %s45_s19 }
  0x2b   :  { %p870_p5 = scmp.ne.s32.totalorder %s45_s19, %s869_s28  ;;  %p875_p7 = scmp.lt.s32.totalorder %s869_s28, %s869_s28 }
  0x2d   :  { %p876_p8 = por %p875_p7, %p874_p6 }
  0x2f   :  { %p877_p9 = pnand %p876_p8, %p870_p5 }
  0x31   :  { %880 = shalt.err (!%p877_p9)
}
  0x32   :  { %50 = dma.hbm_to_vmem [thread:$0]  %s1021_s3, 2048, %s45_s19, [#allocation7], %s911_s30, %s911_s30, %s912_s6  }
  0x33   :  { %903 = dma.done.wait [#allocation4], 2048  }
  0x34   :  { %904 = vsyncadd [#allocation4], 4294965248 }
  0x35   :  { %905 = dma.done.wait [#allocation7], 4096  }
  0x36   :  { %906 = vsyncadd [#allocation7], 4294963200  ;;  %v114_v0 = vld [vmem:[#allocation6] sm:$0xff]  ;;  %v115_v1 = vld [vmem:[#allocation6 + $0x8] sm:$0xff] }
  0x37   :  { %v116_v2 = vld [vmem:[#allocation6 + $0x10] sm:$0xff]  ;;  %v745_v3 = vpack.c.bf16 %v115_v1, %v114_v0  ;;  %v117_v4 = vld [vmem:[#allocation6 + $0x18] sm:$0xff]  ;;  %v118_v6 = vld [vmem:[#allocation6 + $0x20] sm:$0xff] }
  0x38   :  { %v749_v5 = vpack.c.bf16 %v117_v4, %v116_v2  ;;  %v119_v7 = vld [vmem:[#allocation6 + $0x28] sm:$0xff]  ;;  %v98_v9 = vld [vmem:[#allocation3] sm:$0xff]  ;;  %v120_v10 = vld [vmem:[#allocation6 + $0x30] sm:$0xff] }
  0x39   :  { %746 = vmatprep.subr.bf16.mxu0 %v745_v3  ;;  %v753_v8 = vpack.c.bf16 %v119_v7, %v118_v6  ;;  %v121_v11 = vld [vmem:[#allocation6 + $0x38] sm:$0xff]  ;;  %665 = vmatprep.mubr.f32.mxu0 %v98_v9  ;;  %v122_v13 = vld [vmem:[#allocation6 + $0x40] sm:$0xff]  ;;  %v123_v14 = vld [vmem:[#allocation6 + $0x48] sm:$0xff] }
  0x3a   :  { %748 = vmatpush3.bf16.msra.mxu0 %v745_v3  ;;  %v757_v12 = vpack.c.bf16 %v121_v11, %v120_v10  ;;  %v365_v15 = vld [vmem:[#allocation8] sm:$0xff]  ;;  %v366_v16 = vld [vmem:[#allocation8 + $0x8] sm:$0xff]  ;;  %v367_v17 = vld [vmem:[#allocation8 + $0x10] sm:$0xff]  ;;  %v761_v21 = vpack.c.bf16 %v123_v14, %v122_v13 }
  0x3b   :  { %750 = vmatprep.subr.bf16.mxu0 %v749_v5  ;;  %v368_v18 = vld [vmem:[#allocation8 + $0x18] sm:$0xff]  ;;  %v777_v19 = vpack.c.bf16 %v366_v16, %v365_v15  ;;  %v369_v22 = vld [vmem:[#allocation8 + $0x20] sm:$0xff]  ;;  %v370_v23 = vld [vmem:[#allocation8 + $0x28] sm:$0xff] }
  0x3c   :  { %v781_v20 = vpack.c.bf16 %v368_v18, %v367_v17  ;;  %v124_v24 = vld [vmem:[#allocation6 + $0x50] sm:$0xff]  ;;  %v125_v25 = vld [vmem:[#allocation6 + $0x58] sm:$0xff]  ;;  %v785_v26 = vpack.c.bf16 %v370_v23, %v369_v22  ;;  %v126_v30 = vld [vmem:[#allocation6 + $0x60] sm:$0xff] }
  0x3d   :  { %778 = vmatprep.subr.bf16.mxu1 %v777_v19  ;;  %v765_v27 = vpack.c.bf16 %v125_v25, %v124_v24  ;;  %v371_v28 = vld [vmem:[#allocation8 + $0x30] sm:$0xff]  ;;  %v372_v29 = vld [vmem:[#allocation8 + $0x38] sm:$0xff]  ;;  %v127_v31 = vld [vmem:[#allocation6 + $0x68] sm:$0xff] }
  0x3e   :  { %752 = vmatpush3.bf16.msra.mxu0 %v749_v5  ;;  %780 = vmatpush3.bf16.msra.mxu1 %v777_v19  ;;  %v789_v32 = vpack.c.bf16 %v372_v29, %v371_v28  ;;  %v769_v33 = vpack.c.bf16 %v127_v31, %v126_v30  ;;  %v373_v34 = vld [vmem:[#allocation8 + $0x40] sm:$0xff]  ;;  %v374_v35 = vld [vmem:[#allocation8 + $0x48] sm:$0xff]  ;;  %v128_v36 = vld [vmem:[#allocation6 + $0x70] sm:$0xff] }
  0x3f   :  { %754 = vmatprep.subr.bf16.mxu0 %v753_v8  ;;  %782 = vmatprep.subr.bf16.mxu1 %v781_v20  ;;  %v129_v37 = vld [vmem:[#allocation6 + $0x78] sm:$0xff]  ;;  %v793_v38 = vpack.c.bf16 %v374_v35, %v373_v34  ;;  %v375_v40 = vld [vmem:[#allocation8 + $0x50] sm:$0xff]  ;;  %v377_v43 = vld [vmem:[#allocation8 + $0x60] sm:$0xff] }
  0x40   :  { %v773_v39 = vpack.c.bf16 %v129_v37, %v128_v36  ;;  %v376_v41 = vld [vmem:[#allocation8 + $0x58] sm:$0xff]  ;;  %v378_v44 = vld [vmem:[#allocation8 + $0x68] sm:$0xff]  ;;  %v100_v47 = vld [vmem:[#allocation3 + $0x10] sm:$0xff] }
  0x41   :  { %v797_v42 = vpack.c.bf16 %v376_v41, %v375_v40  ;;  %v99_v45 = vld [vmem:[#allocation3 + $0x8] sm:$0xff]  ;;  %v801_v46 = vpack.c.bf16 %v378_v44, %v377_v43  ;;  %v101_v48 = vld [vmem:[#allocation3 + $0x18] sm:$0xff]  ;;  %v102_v49 = vld [vmem:[#allocation3 + $0x20] sm:$0xff] }
  0x42   :  { %756 = vmatpush3.bf16.msra.mxu0 %v753_v8  ;;  %784 = vmatpush3.bf16.msra.mxu1 %v781_v20  ;;  %v103_v50 = vld [vmem:[#allocation3 + $0x28] sm:$0xff]  ;;  %v104_v51 = vld [vmem:[#allocation3 + $0x30] sm:$0xff]  ;;  %v105_v52 = vld [vmem:[#allocation3 + $0x38] sm:$0xff] }
  0x43   :  { %758 = vmatprep.subr.bf16.mxu0 %v757_v12  ;;  %786 = vmatprep.subr.bf16.mxu1 %v785_v26  ;;  %v106_v53 = vld [vmem:[#allocation3 + $0x40] sm:$0xff]  ;;  %v107_v54 = vld [vmem:[#allocation3 + $0x48] sm:$0xff]  ;;  %v108_v55 = vld [vmem:[#allocation3 + $0x50] sm:$0xff] }
  0x44   :  { %v109_v56 = vld [vmem:[#allocation3 + $0x58] sm:$0xff]  ;;  %v110_v57 = vld [vmem:[#allocation3 + $0x60] sm:$0xff]  ;;  %v111_v58 = vld [vmem:[#allocation3 + $0x68] sm:$0xff] }
  0x45   :  { %v112_v59 = vld [vmem:[#allocation3 + $0x70] sm:$0xff]  ;;  %v113_v60 = vld [vmem:[#allocation3 + $0x78] sm:$0xff]  ;;  %v567_v0 = vld [vmem:[%s1020_s2] ss:$0 sm:$0xff] }
  0x46   :  { %760 = vmatpush3.bf16.msra.mxu0 %v757_v12  ;;  %788 = vmatpush3.bf16.msra.mxu1 %v785_v26  ;;  %v379_v61 = vld [vmem:[#allocation8 + $0x70] sm:$0xff]  ;;  %v380_v62 = vld [vmem:[#allocation8 + $0x78] sm:$0xff] }
  0x47   :  { %762 = vmatprep.subr.bf16.mxu0 %v761_v21  ;;  %790 = vmatprep.subr.bf16.mxu1 %v789_v32  ;;  %v805_v63 = vpack.c.bf16 %v380_v62, %v379_v61 }
  0x4a   :  { %764 = vmatpush3.bf16.msra.mxu0 %v761_v21  ;;  %792 = vmatpush3.bf16.msra.mxu1 %v789_v32 }
  0x4b   :  { %766 = vmatprep.subr.bf16.mxu0 %v765_v27  ;;  %794 = vmatprep.subr.bf16.mxu1 %v793_v38 }
  0x4e   :  { %768 = vmatpush3.bf16.msra.mxu0 %v765_v27  ;;  %796 = vmatpush3.bf16.msra.mxu1 %v793_v38 }
  0x4f   :  { %770 = vmatprep.subr.bf16.mxu0 %v769_v33  ;;  %798 = vmatprep.subr.bf16.mxu1 %v797_v42 }
  0x52   :  { %772 = vmatpush3.bf16.msra.mxu0 %v769_v33  ;;  %800 = vmatpush3.bf16.msra.mxu1 %v797_v42 }
  0x53   :  { %774 = vmatprep.subr.bf16.mxu0 %v773_v39  ;;  %802 = vmatprep.subr.bf16.mxu1 %v801_v46 }
  0x56   :  { %776 = vmatpush3.bf16.msra.mxu0 %v773_v39  ;;  %804 = vmatpush3.bf16.msra.mxu1 %v801_v46 }
  0x57   :  { %806 = vmatprep.subr.bf16.mxu1 %v805_v63 }
  0x59   :  { %666 = vmatmul.mubr.f32.vlgmr.msra.gmra.mrb[0].mxu0 %v99_v45 }
  0x5a   :  { %668 = vmatprep.mubr.f32.mxu0 %v100_v47  ;;  %808 = vmatpush3.bf16.msra.mxu1 %v805_v63 }
  0x5d   :  { %669 = vmatmul.mubr.f32.gmra.mrb[2].mxu0 %v101_v48 }
  0x5e   :  { %671 = vmatprep.mubr.f32.mxu0 %v102_v49  ;;  %v568_v49 = vld [vmem:[%s1022_s4] ss:$0 sm:$0xff]  ;;  %s914_s4 = smov [#allocation9]  }
  0x5f   :  { %s554_s8 = sshll.u32 %s914_s4, 4  ;;  %s555_s8 = int_to_ptr.vmem [resolvable:$true] %s554_s8 }
  0x60   :  { %s881_s9 = scalar_lea.vmem %s555_s8, 2048  ;;  %p886_p11 = scmp.lt.s32.totalorder %s555_s8, %s555_s8 }
  0x61   :  { %672 = vmatmul.mubr.f32.gmra.mrb[4].mxu0 %v103_v50  ;;  %p882_p10 = scmp.ne.s32.totalorder %s555_s8, %s881_s9  ;;  %p887_p12 = scmp.lt.s32.totalorder %s881_s9, %s881_s9 }
  0x62   :  { %674 = vmatprep.mubr.f32.mxu0 %v104_v51 }
  0x63   :  { %p888_p13 = por %p887_p12, %p886_p11 }
  0x65   :  { %675 = vmatmul.mubr.f32.gmra.mrb[6].mxu0 %v105_v52  ;;  %p889_p0 = pnand %p888_p13, %p882_p10 }
  0x66   :  { %677 = vmatprep.mubr.f32.mxu0 %v106_v53 }
  0x69   :  { %678 = vmatmul.mubr.f32.gmra.mrb[8].mxu0 %v107_v54 }
  0x6a   :  { %680 = vmatprep.mubr.f32.mxu0 %v108_v55 }
  0x6d   :  { %681 = vmatmul.mubr.f32.gmra.mrb[10].mxu0 %v109_v56 }
  0x6e   :  { %683 = vmatprep.mubr.f32.mxu0 %v110_v57 }
  0x71   :  { %684 = vmatmul.mubr.f32.gmra.mrb[12].mxu0 %v111_v58 }
  0x72   :  { %686 = vmatprep.mubr.f32.mxu0 %v112_v59 }
  0x75   :  { %687 = vmatmul.mubr.f32.gmra.mrb[14].mxu0 %v113_v60 }
 0x12c   :  { %v667_v1 = vpop.f32.mrb[0].mxu0 }
 0x12d   :  { %v334_v2 = vadd.f32 %v667_v1, %v567_v0  ;;  %v196_v3 = vpop.f32.mrb[1].mxu0 }
 0x12e   :  { %v333_v4 = vadd.f32 %v567_v0, %v196_v3 }
 0x12f   :  { %v350_v7 = vmax.f32 %v334_v2, 0.0 }
 0x130   :  { %v670_v5 = vpop.f32.mrb[2].mxu0  ;;  %v349_v6 = vmax.f32 %v333_v4, 0.0 }
 0x131   :  { %v336_v8 = vadd.f32 %v670_v5, %v567_v0  ;;  %v206_v9 = vpop.f32.mrb[3].mxu0 }
 0x132   :  { %v335_v10 = vadd.f32 %v567_v0, %v206_v9  ;;  %721 = vmatprep.mubr.f32.mxu1 %v349_v6 }
 0x133   :  { %722 = vmatmul.mubr.f32.vlgmr.msra.gmra.mrb[0].mxu1 %v350_v7  ;;  %v352_v13 = vmax.f32 %v336_v8, 0.0 }
 0x134   :  { %v351_v11 = vmax.f32 %v335_v10, 0.0  ;;  %v673_v12 = vpop.f32.mrb[4].mxu0 }
 0x135   :  { %v338_v14 = vadd.f32 %v673_v12, %v567_v0  ;;  %v216_v15 = vpop.f32.mrb[5].mxu0 }
 0x136   :  { %v337_v16 = vadd.f32 %v567_v0, %v216_v15  ;;  %724 = vmatprep.mubr.f32.mxu1 %v351_v11 }
 0x137   :  { %725 = vmatmul.mubr.f32.gmra.mrb[2].mxu1 %v352_v13  ;;  %v354_v19 = vmax.f32 %v338_v14, 0.0 }
 0x138   :  { %v353_v17 = vmax.f32 %v337_v16, 0.0  ;;  %v676_v18 = vpop.f32.mrb[6].mxu0 }
 0x139   :  { %v340_v20 = vadd.f32 %v676_v18, %v567_v0  ;;  %v226_v21 = vpop.f32.mrb[7].mxu0 }
 0x13a   :  { %v339_v22 = vadd.f32 %v567_v0, %v226_v21  ;;  %727 = vmatprep.mubr.f32.mxu1 %v353_v17 }
 0x13b   :  { %728 = vmatmul.mubr.f32.gmra.mrb[4].mxu1 %v354_v19  ;;  %v356_v25 = vmax.f32 %v340_v20, 0.0 }
 0x13c   :  { %v355_v23 = vmax.f32 %v339_v22, 0.0  ;;  %v679_v24 = vpop.f32.mrb[8].mxu0 }
 0x13d   :  { %v342_v26 = vadd.f32 %v679_v24, %v567_v0  ;;  %v236_v27 = vpop.f32.mrb[9].mxu0 }
 0x13e   :  { %v341_v28 = vadd.f32 %v567_v0, %v236_v27  ;;  %730 = vmatprep.mubr.f32.mxu1 %v355_v23 }
 0x13f   :  { %731 = vmatmul.mubr.f32.gmra.mrb[6].mxu1 %v356_v25  ;;  %v358_v31 = vmax.f32 %v342_v26, 0.0 }
 0x140   :  { %v357_v29 = vmax.f32 %v341_v28, 0.0  ;;  %v682_v30 = vpop.f32.mrb[10].mxu0 }
 0x141   :  { %v344_v32 = vadd.f32 %v682_v30, %v567_v0  ;;  %v246_v33 = vpop.f32.mrb[11].mxu0 }
 0x142   :  { %v343_v34 = vadd.f32 %v567_v0, %v246_v33  ;;  %733 = vmatprep.mubr.f32.mxu1 %v357_v29 }
 0x143   :  { %734 = vmatmul.mubr.f32.gmra.mrb[8].mxu1 %v358_v31  ;;  %v360_v37 = vmax.f32 %v344_v32, 0.0 }
 0x144   :  { %v359_v35 = vmax.f32 %v343_v34, 0.0  ;;  %v685_v36 = vpop.f32.mrb[12].mxu0 }
 0x145   :  { %v346_v38 = vadd.f32 %v685_v36, %v567_v0  ;;  %v256_v39 = vpop.f32.mrb[13].mxu0 }
 0x146   :  { %v345_v40 = vadd.f32 %v567_v0, %v256_v39  ;;  %736 = vmatprep.mubr.f32.mxu1 %v359_v35 }
 0x147   :  { %737 = vmatmul.mubr.f32.gmra.mrb[10].mxu1 %v360_v37  ;;  %v362_v43 = vmax.f32 %v346_v38, 0.0 }
 0x148   :  { %v361_v41 = vmax.f32 %v345_v40, 0.0  ;;  %v688_v42 = vpop.f32.mrb[14].mxu0 }
 0x149   :  { %v348_v44 = vadd.f32 %v688_v42, %v567_v0  ;;  %v266_v45 = vpop.f32.mrb[15].mxu0 }
 0x14a   :  { %v347_v46 = vadd.f32 %v567_v0, %v266_v45  ;;  %739 = vmatprep.mubr.f32.mxu1 %v361_v41 }
 0x14b   :  { %740 = vmatmul.mubr.f32.gmra.mrb[12].mxu1 %v362_v43  ;;  %v364_v48 = vmax.f32 %v348_v44, 0.0 }
 0x14c   :  { %v363_v47 = vmax.f32 %v347_v46, 0.0 }
 0x14e   :  { %742 = vmatprep.mubr.f32.mxu1 %v363_v47 }
 0x14f   :  { %743 = vmatmul.mubr.f32.gmra.mrb[14].mxu1 %v364_v48 }
 0x206   :  { %v723_v50 = vpop.f32.mrb[0].mxu1 }
 0x207   :  { %v460_v51 = vadd.f32 %v723_v50, %v568_v49  ;;  %v454_v52 = vpop.f32.mrb[1].mxu1 }
 0x208   :  { %v455_v53 = vadd.f32 %v568_v49, %v454_v52 }
 0x209   :  { %534 = vst [vmem:[#allocation9 + $0x8] sm:$0xff] %v460_v51 }
 0x20a   :  { %533 = vst [vmem:[#allocation9] sm:$0xff] %v455_v53  ;;  %v726_v54 = vpop.f32.mrb[2].mxu1 }
 0x20b   :  { %v470_v55 = vadd.f32 %v726_v54, %v568_v49  ;;  %v464_v56 = vpop.f32.mrb[3].mxu1 }
 0x20c   :  { %v465_v57 = vadd.f32 %v568_v49, %v464_v56 }
 0x20d   :  { %536 = vst [vmem:[#allocation9 + $0x18] sm:$0xff] %v470_v55 }
 0x20e   :  { %535 = vst [vmem:[#allocation9 + $0x10] sm:$0xff] %v465_v57  ;;  %v729_v58 = vpop.f32.mrb[4].mxu1 }
 0x20f   :  { %v480_v59 = vadd.f32 %v729_v58, %v568_v49  ;;  %v474_v60 = vpop.f32.mrb[5].mxu1 }
 0x210   :  { %v475_v61 = vadd.f32 %v568_v49, %v474_v60 }
 0x211   :  { %538 = vst [vmem:[#allocation9 + $0x28] sm:$0xff] %v480_v59 }
 0x212   :  { %537 = vst [vmem:[#allocation9 + $0x20] sm:$0xff] %v475_v61  ;;  %v732_v62 = vpop.f32.mrb[6].mxu1 }
 0x213   :  { %v490_v63 = vadd.f32 %v732_v62, %v568_v49  ;;  %v484_v0 = vpop.f32.mrb[7].mxu1 }
 0x214   :  { %v485_v1 = vadd.f32 %v568_v49, %v484_v0 }
 0x215   :  { %540 = vst [vmem:[#allocation9 + $0x38] sm:$0xff] %v490_v63 }
 0x216   :  { %539 = vst [vmem:[#allocation9 + $0x30] sm:$0xff] %v485_v1  ;;  %v735_v2 = vpop.f32.mrb[8].mxu1 }
 0x217   :  { %v500_v3 = vadd.f32 %v735_v2, %v568_v49  ;;  %v494_v4 = vpop.f32.mrb[9].mxu1 }
 0x218   :  { %v495_v5 = vadd.f32 %v568_v49, %v494_v4 }
 0x219   :  { %542 = vst [vmem:[#allocation9 + $0x48] sm:$0xff] %v500_v3 }
 0x21a   :  { %541 = vst [vmem:[#allocation9 + $0x40] sm:$0xff] %v495_v5  ;;  %v738_v6 = vpop.f32.mrb[10].mxu1 }
 0x21b   :  { %v510_v7 = vadd.f32 %v738_v6, %v568_v49  ;;  %v504_v8 = vpop.f32.mrb[11].mxu1 }
 0x21c   :  { %v505_v9 = vadd.f32 %v568_v49, %v504_v8 }
 0x21d   :  { %544 = vst [vmem:[#allocation9 + $0x58] sm:$0xff] %v510_v7 }
 0x21e   :  { %543 = vst [vmem:[#allocation9 + $0x50] sm:$0xff] %v505_v9  ;;  %v741_v10 = vpop.f32.mrb[12].mxu1 }
 0x21f   :  { %v520_v11 = vadd.f32 %v741_v10, %v568_v49  ;;  %v514_v12 = vpop.f32.mrb[13].mxu1 }
 0x220   :  { %v515_v13 = vadd.f32 %v568_v49, %v514_v12 }
 0x221   :  { %546 = vst [vmem:[#allocation9 + $0x68] sm:$0xff] %v520_v11 }
 0x222   :  { %545 = vst [vmem:[#allocation9 + $0x60] sm:$0xff] %v515_v13  ;;  %v744_v14 = vpop.f32.mrb[14].mxu1 }
 0x223   :  { %v530_v15 = vadd.f32 %v744_v14, %v568_v49  ;;  %v524_v16 = vpop.f32.mrb[15].mxu1 }
 0x224   :  { %v525_v17 = vadd.f32 %v568_v49, %v524_v16 }
 0x225   :  { %548 = vst [vmem:[#allocation9 + $0x78] sm:$0xff] %v530_v15 }
 0x226   :  { %547 = vst [vmem:[#allocation9 + $0x70] sm:$0xff] %v525_v17 }
 0x227   :  { %892 = shalt.err (!%p889_p0)
}
 0x228   :  { %s893_s12 = scalar_lea.hbm %s1023_s5, 2048 }
 0x229   :  { %p894_p1 = scmp.ne.s32.totalorder %s1023_s5, %s893_s12  ;;  %p897_p2 = scmp.lt.u32.totalorder %s893_s12, %s1023_s5 }
 0x22b   :  { %p899_p3 = pnand %p897_p2, %p894_p1 }
 0x22d   :  { %902 = shalt.err (!%p899_p3)
}
 0x22e   :  { %560 = dma.vmem_to_hbm [thread:$0]  %s555_s8, 2048, %s1023_s5, [#allocation5], %s911_s30, %s911_s30, %s912_s6  }
 0x22f   :  { %907 = dma.done.wait [#allocation5], 2048  }
 0x230   :  { %908 = vsyncadd [#allocation5], 4294965248 }
 0x231   :  { %564 = vsyncpa [#allocation4], 1 }
 0x232   :  { %565 = vsyncpa [#allocation7], 1 }
 0x233   :  { %566 = vsyncpa [#allocation5], 1 }

</bundles_post_ra>
